<compile_context>
chip_gen: v7x
topology: tpu7x:2x2x1
jax: 0.10.0
libtpu: 0.0.40
codegen_flags: <defaults>
</compile_context>

<pallas_src>
import functools

import numpy as np
import jax
import jax.numpy as jnp
from jax.experimental import pallas as pl
from jax.experimental.pallas import tpu as pltpu

EPS = 1e-5  # PyTorch GroupNorm default eps

# (dh, dw) offsets for the 3x3 taps, kh-major (matches the weight-matrix packing).
_OFFSETS = tuple((kh - 1, kw - 1) for kh in range(3) for kw in range(3))


# ---------------------------------------------------------------------------
# Defensive probe: pin the rotate direction of pltpu.roll to jnp.roll semantics.
# ---------------------------------------------------------------------------
def _roll_matches_jnp():
    x = jnp.arange(8 * 128, dtype=jnp.float32).reshape(8, 128)

    def k(x_ref, o_ref):
        o_ref[...] = pltpu.roll(x_ref[...], shift=1, axis=1)

    y = pl.pallas_call(k, out_shape=jax.ShapeDtypeStruct((8, 128), jnp.float32))(x)
    return bool(jnp.array_equal(y, jnp.roll(x, 1, axis=1)))


# ---------------------------------------------------------------------------
# Pallas kernel: GroupNorm -> ReLU -> conv3x3 -> GroupNorm -> ReLU -> conv3x3 -> +x
# ---------------------------------------------------------------------------
def _make_block_kernel(N, C, H, W, roll_like_jnp):
    HW = H * W
    R = N * C

    def kernel(x_ref, g1_ref, b1_ref, bm1_ref, g2_ref, b2_ref, bm2_ref,
               masks_ref, out_ref):
        x = x_ref[...]              # (R, HW) f32, lane-dense (HW is a mult. of 128)
        masks = masks_ref[...]      # (9, HW) f32 zero-padding edge masks

        def gnorm_relu(h, g_ref, b_ref):
            # GroupNorm with num_groups = min(32, C) == C here -> per-(n, c) row
            # statistics over the HW lane axis, then affine + ReLU.
            mean = jnp.mean(h, axis=1, keepdims=True)
            var = jnp.mean((h - mean) ** 2, axis=1, keepdims=True)
            hn = (h - mean) * jax.lax.rsqrt(var + EPS)
            return jnp.maximum(hn * g_ref[...] + b_ref[...], 0.0)

        def conv3x3(h, bm_ref):
            # 3x3 'same' conv, bias-free.  Build the 9 shifted + edge-masked copies
            # of the (R, HW) activation with lane rolls (XLU), stack them along the
            # sublane axis (im2col) and do ONE MXU matmul with the host-built block
            # channel-mixing matrix bm (R, 9R).
            planes = []
            for k, (dh, dw) in enumerate(_OFFSETS):
                d = dh * W + dw                       # flattened source offset
                if d == 0:
                    sh = h
                else:
                    # want sh[p] = h[p + d]
                    shift = (-d) % HW if roll_like_jnp else d % HW
                    sh = pltpu.roll(h, shift=shift, axis=1)
                planes.append(sh * masks[k:k + 1, :])
            s = jnp.concatenate(planes, axis=0)       # (9R, HW)
            return jnp.dot(bm_ref[...], s, preferred_element_type=jnp.float32)

        h = gnorm_relu(x, g1_ref, b1_ref)     # relu(norm1(x))
        h = conv3x3(h, bm1_ref)               # conv1
        h = gnorm_relu(h, g2_ref, b2_ref)     # relu(norm2(.))
        h = conv3x3(h, bm2_ref)               # conv2
        out_ref[...] = h + x                  # + residual  (single full-width store)

    return kernel


# ---------------------------------------------------------------------------
# Host-side parameter / constant preprocessing
# ---------------------------------------------------------------------------
def _edge_masks(H, W):
    """(9, HW) masks: 1 where the shifted source pixel is inside the image."""
    HW = H * W
    pos = np.arange(HW)
    row, col = pos // W, pos % W
    m = np.zeros((9, HW), np.float32)
    for k, (dh, dw) in enumerate(_OFFSETS):
        valid = (row + dh >= 0) & (row + dh < H) & (col + dw >= 0) & (col + dw < W)
        m[k] = valid.astype(np.float32)
    return jnp.asarray(m)


def _conv_to_mix_matrix(w, n_batch):
    """OIHW (C,C,3,3) conv weight -> (N*C, 9*N*C) block matrix B so that
    conv(h) == B @ [9 shifted copies of h stacked along rows]."""
    c_out, c_in = w.shape[0], w.shape[1]
    wk = jnp.transpose(w.astype(jnp.float32), (2, 3, 0, 1)).reshape(9, c_out, c_in)
    eye = jnp.eye(n_batch, dtype=jnp.float32)
    bm = jnp.einsum("nm,koi->nokmi", eye, wk)         # (N, O, 9, N, I)
    return bm.reshape(n_batch * c_out, 9 * n_batch * c_in)


def _per_row(v, n_batch, c):
    """Per-channel GroupNorm affine param -> per-(n, c) row vector (N*C, 1)."""
    return jnp.tile(jnp.asarray(v, jnp.float32).reshape(1, c),
                    (n_batch, 1)).reshape(n_batch * c, 1)


# ---------------------------------------------------------------------------
# Forward wrapper
# ---------------------------------------------------------------------------
@functools.partial(jax.jit, static_argnames=("roll_like_jnp",))
def basic_residual_block_forward(x, params, *, roll_like_jnp=True):
    N, C, H, W = x.shape
    if min(32, C) != C:
        # TODO(synk): grouped (group_size > 1) GroupNorm stats for C > 32; the test
        # configuration (C <= 32) uses per-channel groups, matching num_groups=C.
        raise NotImplementedError("C > 32 (group_size > 1) GroupNorm not implemented")
    # TODO(synk): stride != 1 / downsample branch of BasicResidualBlock is not needed
    # for the default (stride=1, downsample=None) configuration exercised here.

    R, HW = N * C, H * W
    x2d = x.astype(jnp.float32).reshape(R, HW)
    bm1 = _conv_to_mix_matrix(params["w1"], N)
    bm2 = _conv_to_mix_matrix(params["w2"], N)
    g1 = _per_row(params["g1"], N, C)
    b1 = _per_row(params["be1"], N, C)
    g2 = _per_row(params["g2"], N, C)
    b2 = _per_row(params["be2"], N, C)
    masks = _edge_masks(H, W)

    flops = 4 * R * (9 * R) * HW + 24 * R * HW        # 2 MXU convs + elementwise
    bytes_accessed = 4 * (2 * R * HW + 2 * R * 9 * R + 9 * HW + 4 * R)

    vmem = pl.BlockSpec(memory_space=pltpu.MemorySpace.VMEM)
    out2d = pl.pallas_call(
        _make_block_kernel(N, C, H, W, roll_like_jnp),
        out_shape=jax.ShapeDtypeStruct((R, HW), jnp.float32),
        in_specs=[vmem] * 8,
        out_specs=vmem,
        cost_estimate=pl.CostEstimate(flops=flops, transcendentals=2 * R,
                                      bytes_accessed=bytes_accessed),
    )(x2d, g1, b1, bm1, g2, b2, bm2, masks)
    return out2d.reshape(N, C, H, W)


# ---------------------------------------------------------------------------
# Pure-JAX reference (correctness check only)
# ---------------------------------------------------------------------------
def basic_residual_block_ref(x, params):
    N, C, H, W = x.shape
    G = min(32, C)

    def gn(h, g, b):
        hg = h.reshape(N, G, C // G, H, W)
        mean = jnp.mean(hg, axis=(2, 3, 4), keepdims=True)
        var = jnp.mean((hg - mean) ** 2, axis=(2, 3, 4), keepdims=True)
        hn = ((hg - mean) * jax.lax.rsqrt(var + EPS)).reshape(N, C, H, W)
        return hn * g.reshape(1, C, 1, 1) + b.reshape(1, C, 1, 1)

    def conv(h, w):
        return jax.lax.conv_general_dilated(
            h, w, window_strides=(1, 1), padding=((1, 1), (1, 1)),
            dimension_numbers=("NCHW", "OIHW", "NCHW"),
            precision=jax.lax.Precision.HIGHEST)

    out = jax.nn.relu(gn(x, params["g1"], params["be1"]))
    out = conv(out, params["w1"])
    out = jax.nn.relu(gn(out, params["g2"], params["be2"]))
    out = conv(out, params["w2"])
    return out + x


if __name__ == "__main__":
    N, C, H, W = 2, 4, 16, 16
    key = jax.random.PRNGKey(0)
    kx, kw1, kw2, kg1, kb1, kg2, kb2 = jax.random.split(key, 7)

    x = jax.random.normal(kx, (N, C, H, W), dtype=jnp.float32)
    params = {
        # PyTorch Conv2d OIHW weights, bias=False
        "w1": 0.1 * jax.random.normal(kw1, (C, C, 3, 3), dtype=jnp.float32),
        "w2": 0.1 * jax.random.normal(kw2, (C, C, 3, 3), dtype=jnp.float32),
        # GroupNorm affine params (randomized to exercise the affine path)
        "g1": 1.0 + 0.1 * jax.random.normal(kg1, (C,), dtype=jnp.float32),
        "be1": 0.1 * jax.random.normal(kb1, (C,), dtype=jnp.float32),
        "g2": 1.0 + 0.1 * jax.random.normal(kg2, (C,), dtype=jnp.float32),
        "be2": 0.1 * jax.random.normal(kb2, (C,), dtype=jnp.float32),
    }

    roll_like_jnp = _roll_matches_jnp()

    y = basic_residual_block_forward(x, params, roll_like_jnp=roll_like_jnp)
    jax.block_until_ready(y)

    y_ref = basic_residual_block_ref(x, params)
    np.testing.assert_allclose(np.asarray(y), np.asarray(y_ref),
                               rtol=2e-2, atol=2e-2)

    print("KERNEL_OK")
</pallas_src>

<mosaic_0001>
module attributes {stable_mosaic.version = 11 : i64} {
  func.func @k(%arg0: memref<8x128xf32, #tpu.memory_space<vmem>>, %arg1: memref<8x128xf32, #tpu.memory_space<vmem>>) attributes {dimension_semantics = [], scalar_prefetch = 0 : i64, scratch_operands = 0 : i64, tpu.core_type = #tpu.core_type<tc>} {
    %c0 = arith.constant 0 : index
    %c0_0 = arith.constant 0 : index
    %0 = vector.load %arg0[%c0, %c0_0] : memref<8x128xf32, #tpu.memory_space<vmem>>, vector<8x128xf32>
    %c1_i32 = arith.constant 1 : i32
    %1 = tpu.dynamic_rotate %0 by %c1_i32 dim 1 : vector<8x128xf32>, i32 -> vector<8x128xf32>
    %c0_1 = arith.constant 0 : index
    %c0_2 = arith.constant 0 : index
    %2 = vector.load %arg1[%c0_1, %c0_2] : memref<8x128xf32, #tpu.memory_space<vmem>>, vector<8x128xf32>
    tpu.vector_store %arg1[%c0_1, %c0_2], %1 {strides = array<i32>} : memref<8x128xf32, #tpu.memory_space<vmem>>, vector<8x128xf32>,
    return
  }
}

</mosaic_0001>

<bundles_post_ra>
// kernel: tpu_custom_call.1
= control target key start
LH: loop header
LB: loop body
LE: loop exit
PB: predicated region body
PF: predicated region fallthrough
CT: control target
= control target key end

     0   :  { %6 = vsyncpa [#allocation3], 0  ;;  %s128_s0 = inlined_call_operand.hbm [shape: f32[8,128], index: 0, kind: input, shape index: {}]   ;;  %s129_s1 = inlined_call_operand.hbm [shape: f32[8,128], index: 1, kind: output, shape index: {}]  }
   0x1   :  { %7 = vsyncpa [#allocation4], 0  ;;  %s91_s6 = smov [#allocation2]   ;;  %s43_s10 = scalar_lea.hbm %s128_s0, 128 }
   0x2   :  { %s14_s7 = sshll.u32 %s91_s6, 4  ;;  %p44_p0 = scmp.ne.s32.totalorder %s128_s0, %s43_s10  ;;  %s15_s7 = int_to_ptr.vmem [resolvable:$true] %s14_s7 }
   0x3   :  { %p47_p1 = scmp.lt.u32.totalorder %s43_s10, %s128_s0 }
   0x5   :  { %p49_p2 = pnand %p47_p1, %p44_p0 }
   0x7   :  { %52 = shalt.err (!%p49_p2)
}
   0x8   :  { %s53_s15 = scalar_lea.vmem %s15_s7, 128  ;;  %p58_p4 = scmp.lt.s32.totalorder %s15_s7, %s15_s7 }
   0x9   :  { %p54_p3 = scmp.ne.s32.totalorder %s15_s7, %s53_s15  ;;  %p59_p5 = scmp.lt.s32.totalorder %s53_s15, %s53_s15 }
   0xb   :  { %p60_p6 = por %p59_p5, %p58_p4 }
   0xd   :  { %p61_p7 = pnand %p60_p6, %p54_p3 }
   0xf   :  { %64 = shalt.err (!%p61_p7)
}
  0x10   :  { %17 = dma.hbm_to_vmem [thread:$0]  %s128_s0, 128, %s15_s7, [#allocation3]  }
  0x11   :  { %87 = dma.done.wait [#allocation3], 128  }
  0x12   :  { %88 = vsyncadd [#allocation3], 4294967168  ;;  %v21_v0 = vld [vmem:[#allocation2] sm:$0xff]  ;;  %s92_s18 = smov 1   ;;  %s93_s19 = smov [#allocation5]  }
  0x13   :  { %22 = vrot.lane.b32.xlu0 %v21_v0, %s92_s18  ;;  %s31_s20 = sshll.u32 %s93_s19, 4  ;;  %s32_s20 = int_to_ptr.vmem [resolvable:$true] %s31_s20 }
  0x14   :  { %s65_s21 = scalar_lea.vmem %s32_s20, 128  ;;  %p70_p9 = scmp.lt.s32.totalorder %s32_s20, %s32_s20 }
  0x15   :  { %p66_p8 = scmp.ne.s32.totalorder %s32_s20, %s65_s21  ;;  %p71_p10 = scmp.lt.s32.totalorder %s65_s21, %s65_s21 }
  0x17   :  { %p72_p11 = por %p71_p10, %p70_p9 }
  0x19   :  { %p73_p12 = pnand %p72_p11, %p66_p8 }
  0x85   :  { %v23_v1 = vpop.permute.xlu0 %22 }
  0x86   :  { %24 = vst [vmem:[#allocation5] sm:$0xff] %v23_v1 }
  0x87   :  { %76 = shalt.err (!%p73_p12)
}
  0x88   :  { %s77_s0 = scalar_lea.hbm %s129_s1, 128 }
  0x89   :  { %p78_p13 = scmp.ne.s32.totalorder %s129_s1, %s77_s0  ;;  %p81_p0 = scmp.lt.u32.totalorder %s77_s0, %s129_s1 }
  0x8b   :  { %p83_p1 = pnand %p81_p0, %p78_p13 }
  0x8d   :  { %86 = shalt.err (!%p83_p1)
}
  0x8e   :  { %34 = dma.vmem_to_hbm [thread:$0]  %s32_s20, 128, %s129_s1, [#allocation4]  }
  0x8f   :  { %89 = dma.done.wait [#allocation4], 128  }
  0x90   :  { %90 = vsyncadd [#allocation4], 4294967168 }
  0x91   :  { %38 = vsyncpa [#allocation3], 1 }
  0x92   :  { %39 = vsyncpa [#allocation4], 1 }

</bundles_post_ra>
